<compile_context>
chip_gen: v7x
topology: tpu7x:2x2x1
jax: 0.10.0
libtpu: 0.0.40
codegen_flags: <defaults>
</compile_context>

<pallas_src>
import jax
import jax.numpy as jnp
import numpy as np
from jax.experimental import pallas as pl
from jax.experimental.pallas import tpu as pltpu


def nv_at_level(level: int) -> int:
    # icosphere vertex count at subdivision `level`
    return 10 * 4 ** level + 2


def _round_up(x: int, m: int) -> int:
    return ((x + m - 1) // m) * m


# ----------------------------------------------------------------------------
# Pallas kernel: whole residual block for a block of `bb` batch elements
# ----------------------------------------------------------------------------
def make_kernel(bb: int, out_pad: int, neck_pad: int):
    bf16 = jnp.bfloat16
    f32 = jnp.float32

    def kernel(x_ref, w_in_ref, b_in_ref, ops_ref, c_ref, mb_ref, w3_ref,
               o_ref):
        v_pad = ops_ref.shape[0]
        w_in = w_in_ref[...]                    # (out_pad+neck_pad, in_ch) bf16
        ops = ops_ref[...]                      # (v_pad, 3*v_pad)          bf16
        c = c_ref[...]                          # (4, neck_pad, neck_pad)   bf16
        w3 = w3_ref[...]                        # (out_pad, neck_pad)       bf16
        # hoist bias broadcasts out of the (small, bounded) batch loops
        b_in = jnp.broadcast_to(b_in_ref[...], (out_pad + neck_pad, v_pad))
        mb = jnp.broadcast_to(mb_ref[...], (neck_pad, v_pad))

        # --- fused 1x1 convs (shortcut + main), BN folded, biases merged -----
        sc_list, h_list = [], []
        for j in range(bb):                     # bb <= 8: bounded static unroll
            xj = x_ref[j].astype(bf16)          # (in_ch, v_pad), 'drop'-sampled
            ha = jnp.dot(w_in, xj, preferred_element_type=f32) + b_in
            sc_list.append(ha[:out_pad])        # shortcut (bsc + b3 folded in)
            h_list.append(jnp.maximum(ha[out_pad:], 0.0))   # conv1+BN1+ReLU

        # --- MeshConv operators: ONE batch-folded MXU dot (the heavy one) ----
        # M = bb*neck_pad rows instead of bb separate dots with M = neck.
        H16 = jnp.concatenate(h_list, axis=0).astype(bf16)   # (bb*neck_pad, v_pad)
        hops = jnp.dot(H16, ops, preferred_element_type=f32)  # (bb*neck_pad, 3*v_pad)

        # --- channel mixing (4 small dots, no reshuffle) + conv3 + residual --
        for j in range(bb):
            r0 = j * neck_pad
            h16 = H16[r0:r0 + neck_pad]                        # 8-row aligned
            acc = jnp.dot(c[0], h16, preferred_element_type=f32) + mb
            for k in range(3):                                 # lap / ew / ns
                piece = hops[r0:r0 + neck_pad,
                             k * v_pad:(k + 1) * v_pad].astype(bf16)
                acc = acc + jnp.dot(c[k + 1], piece,
                                    preferred_element_type=f32)
            m16 = jnp.maximum(acc, 0.0).astype(bf16)           # BN2 folded + ReLU
            y = jnp.dot(w3, m16, preferred_element_type=f32) + sc_list[j]
            o_ref[j] = jnp.maximum(y, 0.0)
    return kernel


# ----------------------------------------------------------------------------
# Wrapper: grid / BlockSpecs
# ----------------------------------------------------------------------------
def _pick_batch_block(b: int, cap: int = 8) -> int:
    """Largest divisor of b that is <= cap (bounds the in-kernel unroll)."""
    bb = 1
    for d in range(1, min(b, cap) + 1):
        if b % d == 0:
            bb = d
    return bb


def down_forward(x, p, v_out, *, batch_block=None, slice_output=True):
    b, in_ch, v_in = x.shape
    out_ch, out_pad, neck_pad = p["out_ch"], p["out_pad"], p["neck_pad"]
    v_pad = p["ops"].shape[0]

    bb = _pick_batch_block(b) if batch_block is None else batch_block
    if b % bb != 0:
        bb = 1
    grid = (b // bb,)

    # 'drop' downsample: only the first v_out vertices are ever used.  The
    # input BlockSpec reads only the first v_pad (>= v_out) lanes of x, so no
    # wrapper-side slice/pad copy is needed (lanes >= v_out are dead: the
    # operator rows there are zero and the output is sliced back to v_out).
    if v_in < v_pad:      # only possible for a level-0 target mesh
        x = jnp.pad(x, ((0, 0), (0, 0), (0, v_pad - v_in)))

    def const(a):
        nd = a.ndim
        return pl.BlockSpec(a.shape, lambda i, _n=nd: (0,) * _n)

    # TODO(synk): at real mesh levels give p["ops"] pipeline_mode=pl.Buffered(1)
    # and tile it over the vertex dim (trailing 'arbitrary' grid axis +
    # accumulator) so a single-buffered copy fits v7x's 64 MiB per-TC VMEM.
    in_specs = [
        pl.BlockSpec((bb, in_ch, v_pad), lambda i: (i, 0, 0)),
        const(p["w_in"]), const(p["b_in"]), const(p["ops"]),
        const(p["c"]), const(p["mb"]), const(p["w3"]),
    ]

    out = pl.pallas_call(
        make_kernel(bb, out_pad, neck_pad),
        out_shape=jax.ShapeDtypeStruct((b, out_pad, v_pad), jnp.float32),
        grid=grid,
        in_specs=in_specs,
        out_specs=pl.BlockSpec((bb, out_pad, v_pad), lambda i: (i, 0, 0)),
        compiler_params=pltpu.CompilerParams(
            dimension_semantics=("parallel",),
            vmem_limit_bytes=64 * 1024 * 1024),
    )(x, p["w_in"], p["b_in"], p["ops"], p["c"], p["mb"], p["w3"])

    if slice_output:
        # In a full Down/Up chain keep the padded (out_pad, v_pad) layout and
        # slice only once at the model boundary.
        out = out[:, :out_ch, :v_out]
    return out


# ----------------------------------------------------------------------------
# Deterministic parameter construction (synthetic, no checkpoint)
# ----------------------------------------------------------------------------
def init_params(key, in_ch, out_ch, v_out, v_pad):
    neck = in_ch
    neck_pad = _round_up(neck, 8)
    out_pad = _round_up(out_ch, 8)
    ks = jax.random.split(key, 16)

    def nrm(k, shape, scale=0.1):
        return scale * jax.random.normal(k, shape, jnp.float32)

    conv1_w = nrm(ks[0], (neck, in_ch))
    conv1_b = nrm(ks[1], (neck,))
    coeffs = nrm(ks[2], (neck, neck, 4))       # MeshConv coeffs [out, in, 4]
    mesh_b = nrm(ks[3], (neck,))
    conv3_w = nrm(ks[4], (out_ch, neck))
    conv3_b = nrm(ks[5], (out_ch,))
    convsc_w = nrm(ks[6], (out_ch, in_ch))
    convsc_b = nrm(ks[7], (out_ch,))
    # TODO(synk): real operators are sparse matrices from the icosphere mesh file.
    lop = nrm(ks[8], (v_out, v_out))
    ewop = nrm(ks[9], (v_out, v_out))
    nsop = nrm(ks[10], (v_out, v_out))

    def bn(k, c):
        k1, k2, k3, k4 = jax.random.split(k, 4)
        gamma = 1.0 + 0.1 * jax.random.normal(k1, (c,), jnp.float32)
        beta = 0.1 * jax.random.normal(k2, (c,), jnp.float32)
        mean = 0.1 * jax.random.normal(k3, (c,), jnp.float32)
        var = 1.0 + 0.1 * jax.random.uniform(k4, (c,), jnp.float32)
        return gamma, beta, mean, var

    bn1, bn2 = bn(ks[11], neck), bn(ks[12], neck)
    bn3, bnsc = bn(ks[13], out_ch), bn(ks[14], out_ch)
    eps = 1e-5

    def fold(w, b_, bnp):
        gamma, beta, mean, var = bnp
        s = gamma / jnp.sqrt(var + eps)
        return w * s[:, None], s * (b_ - mean) + beta

    w1f, b1f = fold(conv1_w, conv1_b, bn1)
    s2 = bn2[0] / jnp.sqrt(bn2[3] + eps)
    coeffs_f = coeffs * s2[:, None, None]
    mb_f = s2 * (mesh_b - bn2[2]) + bn2[1]
    w3f, b3f = fold(conv3_w, conv3_b, bn3)
    wscf, bscf = fold(convsc_w, convsc_b, bnsc)

    # bf16 matmul operands (identical rounded values used by kernel & reference)
    bf = jnp.bfloat16
    w1b, wscb, w3b = w1f.astype(bf), wscf.astype(bf), w3f.astype(bf)
    cb = coeffs_f.astype(bf)
    lop_t, ewop_t, nsop_t = lop.T.astype(bf), ewop.T.astype(bf), nsop.T.astype(bf)

    # ---- fused / sublane-padded kernel params -------------------------------
    w_in = jnp.zeros((out_pad + neck_pad, in_ch), bf)
    w_in = w_in.at[:out_ch].set(wscb).at[out_pad:out_pad + neck].set(w1b)
    b_in = jnp.zeros((out_pad + neck_pad, 1), jnp.float32)
    b_in = (b_in.at[:out_ch, 0].set(bscf + b3f)          # b3 folded into shortcut
                 .at[out_pad:out_pad + neck, 0].set(b1f))

    opad = ((0, v_pad - v_out), (0, v_pad - v_out))
    ops = jnp.concatenate([jnp.pad(lop_t, opad), jnp.pad(ewop_t, opad),
                           jnp.pad(nsop_t, opad)], axis=1)    # (v_pad, 3*v_pad)

    c = jnp.zeros((4, neck_pad, neck_pad), bf)
    for k in range(4):                                        # id, lap, ew, ns
        c = c.at[k, :neck, :neck].set(cb[:, :, k])
    mb = jnp.zeros((neck_pad, 1), jnp.float32).at[:neck, 0].set(mb_f)
    w3 = jnp.zeros((out_pad, neck_pad), bf).at[:out_ch, :neck].set(w3b)

    fused = dict(w_in=w_in, b_in=b_in, ops=ops, c=c, mb=mb, w3=w3,
                 out_ch=out_ch, out_pad=out_pad, neck_pad=neck_pad)
    ref = dict(w1=w1b, b1=b1f, wsc=wscb, bsc=bscf, w3=w3b, b3=b3f,
               c=cb, mb=mb_f, lop_t=lop_t, ewop_t=ewop_t, nsop_t=nsop_t)
    return fused, ref


# ----------------------------------------------------------------------------
# Plain-JAX reference (same semantics, unfused).  It mirrors the kernel's
# bf16-operand / f32-accumulation MXU dtype choice so the check is
# apples-to-apples.
# ----------------------------------------------------------------------------
def reference(x, r, v_out):
    bf, f32 = jnp.bfloat16, jnp.float32
    xd = x[:, :, :v_out].astype(bf)                       # 'drop' downsample
    h = (jnp.einsum("oi,biv->bov", r["w1"], xd, preferred_element_type=f32)
         + r["b1"][None, :, None])
    h = jnp.maximum(h, 0.0)
    hb = h.astype(bf)
    lap = jnp.einsum("biv,vw->biw", hb, r["lop_t"], preferred_element_type=f32)
    ew = jnp.einsum("biv,vw->biw", hb, r["ewop_t"], preferred_element_type=f32)
    ns = jnp.einsum("biv,vw->biw", hb, r["nsop_t"], preferred_element_type=f32)
    m = (jnp.einsum("oi,biv->bov", r["c"][:, :, 0], hb,
                    preferred_element_type=f32)
         + r["mb"][None, :, None]
         + jnp.einsum("oi,biv->bov", r["c"][:, :, 1], lap.astype(bf),
                      preferred_element_type=f32)
         + jnp.einsum("oi,biv->bov", r["c"][:, :, 2], ew.astype(bf),
                      preferred_element_type=f32)
         + jnp.einsum("oi,biv->bov", r["c"][:, :, 3], ns.astype(bf),
                      preferred_element_type=f32))
    m = jnp.maximum(m, 0.0)
    y1 = (jnp.einsum("oi,biv->bov", r["w3"], m.astype(bf),
                     preferred_element_type=f32) + r["b3"][None, :, None])
    sc = (jnp.einsum("oi,biv->bov", r["wsc"], xd, preferred_element_type=f32)
          + r["bsc"][None, :, None])
    return jnp.maximum(y1 + sc, 0.0)


if __name__ == "__main__":
    key = jax.random.PRNGKey(0)
    k_par, k_x = jax.random.split(key)

    batch, in_ch, out_ch, level = 2, 4, 8, 1
    v_in = nv_at_level(level + 1)       # 162 vertices at level 2 (input mesh)
    v_out = nv_at_level(level)          # 42  vertices at level 1 (coarsened)
    v_pad = _round_up(v_out, 128)       # lane-dense padded vertex dim (128)

    fused_p, ref_p = init_params(k_par, in_ch, out_ch, v_out, v_pad)
    x = jax.random.normal(k_x, (batch, in_ch, v_in), jnp.float32)

    y = jax.block_until_ready(down_forward(x, fused_p, v_out))
    y_ref = reference(x, ref_p, v_out)

    assert y.shape == (batch, out_ch, v_out)
    np.testing.assert_allclose(np.asarray(y), np.asarray(y_ref),
                               rtol=2e-3, atol=2e-3)
    print("KERNEL_OK")
</pallas_src>

<mosaic_0001>
module attributes {stable_mosaic.version = 11 : i64} {
  func.func @kernel(%arg0: i32, %arg1: memref<2x4x128xf32, #tpu.memory_space<vmem>>, %arg2: memref<16x4xbf16, #tpu.memory_space<vmem>>, %arg3: memref<16x1xf32, #tpu.memory_space<vmem>>, %arg4: memref<128x384xbf16, #tpu.memory_space<vmem>>, %arg5: memref<4x8x8xbf16, #tpu.memory_space<vmem>>, %arg6: memref<8x1xf32, #tpu.memory_space<vmem>>, %arg7: memref<8x8xbf16, #tpu.memory_space<vmem>>, %arg8: memref<2x8x128xf32, #tpu.memory_space<vmem>>) attributes {dimension_semantics = [#tpu.dimension_semantics<parallel>], iteration_bounds = array<i64: 1>, scalar_prefetch = 0 : i64, scratch_operands = 0 : i64, tpu.core_type = #tpu.core_type<tc>, window_params = [{transform_indices = @transform_0, window_bounds = array<i64: 2, 4, 128>}, {pipeline_mode = #tpu.pipeline_mode<synchronous>, transform_indices = @transform_1, window_bounds = array<i64: 16, 4>}, {pipeline_mode = #tpu.pipeline_mode<synchronous>, transform_indices = @transform_2, window_bounds = array<i64: 16, 1>}, {pipeline_mode = #tpu.pipeline_mode<synchronous>, transform_indices = @transform_3, window_bounds = array<i64: 128, 384>}, {pipeline_mode = #tpu.pipeline_mode<synchronous>, transform_indices = @transform_4, window_bounds = array<i64: 4, 8, 8>}, {pipeline_mode = #tpu.pipeline_mode<synchronous>, transform_indices = @transform_5, window_bounds = array<i64: 8, 1>}, {pipeline_mode = #tpu.pipeline_mode<synchronous>, transform_indices = @transform_6, window_bounds = array<i64: 8, 8>}, {transform_indices = @transform_7, window_bounds = array<i64: 2, 8, 128>}]} {
    %c0 = arith.constant 0 : index
    %c0_0 = arith.constant 0 : index
    %0 = vector.load %arg2[%c0, %c0_0] : memref<16x4xbf16, #tpu.memory_space<vmem>>, vector<16x4xbf16>
    %c0_1 = arith.constant 0 : index
    %c0_2 = arith.constant 0 : index
    %1 = vector.load %arg4[%c0_1, %c0_2] : memref<128x384xbf16, #tpu.memory_space<vmem>>, vector<128x384xbf16>
    %c0_3 = arith.constant 0 : index
    %c0_4 = arith.constant 0 : index
    %c0_5 = arith.constant 0 : index
    %2 = vector.load %arg5[%c0_3, %c0_4, %c0_5] : memref<4x8x8xbf16, #tpu.memory_space<vmem>>, vector<4x8x8xbf16>
    %c0_6 = arith.constant 0 : index
    %c0_7 = arith.constant 0 : index
    %3 = vector.load %arg7[%c0_6, %c0_7] : memref<8x8xbf16, #tpu.memory_space<vmem>>, vector<8x8xbf16>
    %c0_8 = arith.constant 0 : index
    %c0_9 = arith.constant 0 : index
    %4 = vector.load %arg3[%c0_8, %c0_9] : memref<16x1xf32, #tpu.memory_space<vmem>>, vector<16x1xf32>
    %5 = vector.shape_cast %4 : vector<16x1xf32> to vector<16x1xf32>
    %6 = vector.broadcast %5 : vector<16x1xf32> to vector<16x128xf32>
    %c0_10 = arith.constant 0 : index
    %c0_11 = arith.constant 0 : index
    %7 = vector.load %arg6[%c0_10, %c0_11] : memref<8x1xf32, #tpu.memory_space<vmem>>, vector<8x1xf32>
    %8 = vector.shape_cast %7 : vector<8x1xf32> to vector<8x1xf32>
    %9 = vector.broadcast %8 : vector<8x1xf32> to vector<8x128xf32>
    %c0_12 = arith.constant 0 : index
    %c0_13 = arith.constant 0 : index
    %c0_14 = arith.constant 0 : index
    %10 = vector.load %arg1[%c0_12, %c0_13, %c0_14] : memref<2x4x128xf32, #tpu.memory_space<vmem>>, vector<1x4x128xf32>
    %11 = vector.shape_cast %10 : vector<1x4x128xf32> to vector<4x128xf32>
    %12 = arith.truncf %11 : vector<4x128xf32> to vector<4x128xbf16>
    %cst = arith.constant dense<0.000000e+00> : vector<16x128xf32>
    %13 = tpu.matmul %0, %12, %cst {dimension_numbers = #tpu.dot_dimension_numbers<[1], [0], [0], [1], [0, 0, 1, 1], [], []>} : vector<16x4xbf16>, vector<4x128xbf16>, vector<16x128xf32> -> vector<16x128xf32>
    %14 = arith.addf %13, %6 : vector<16x128xf32>
    %15 = vector.extract_strided_slice %14 {offsets = [0, 0], sizes = [8, 128], strides = [1, 1]} : vector<16x128xf32> to vector<8x128xf32>
    %16 = vector.extract_strided_slice %14 {offsets = [8, 0], sizes = [8, 128], strides = [1, 1]} : vector<16x128xf32> to vector<8x128xf32>
    %cst_15 = arith.constant 0.000000e+00 : f32
    %17 = vector.broadcast %cst_15 : f32 to vector<8x128xf32>
    %18 = arith.maximumf %16, %17 : vector<8x128xf32>
    %c1 = arith.constant 1 : index
    %c0_16 = arith.constant 0 : index
    %c0_17 = arith.constant 0 : index
    %19 = vector.load %arg1[%c1, %c0_16, %c0_17] : memref<2x4x128xf32, #tpu.memory_space<vmem>>, vector<1x4x128xf32>
    %20 = vector.shape_cast %19 : vector<1x4x128xf32> to vector<4x128xf32>
    %21 = arith.truncf %20 : vector<4x128xf32> to vector<4x128xbf16>
    %cst_18 = arith.constant dense<0.000000e+00> : vector<16x128xf32>
    %22 = tpu.matmul %0, %21, %cst_18 {dimension_numbers = #tpu.dot_dimension_numbers<[1], [0], [0], [1], [0, 0, 1, 1], [], []>} : vector<16x4xbf16>, vector<4x128xbf16>, vector<16x128xf32> -> vector<16x128xf32>
    %23 = arith.addf %22, %6 : vector<16x128xf32>
    %24 = vector.extract_strided_slice %23 {offsets = [0, 0], sizes = [8, 128], strides = [1, 1]} : vector<16x128xf32> to vector<8x128xf32>
    %25 = vector.extract_strided_slice %23 {offsets = [8, 0], sizes = [8, 128], strides = [1, 1]} : vector<16x128xf32> to vector<8x128xf32>
    %cst_19 = arith.constant 0.000000e+00 : f32
    %26 = vector.broadcast %cst_19 : f32 to vector<8x128xf32>
    %27 = arith.maximumf %25, %26 : vector<8x128xf32>
    %28 = tpu.concatenate %18, %27 in 0 : vector<8x128xf32>, vector<8x128xf32> -> vector<16x128xf32>
    %29 = arith.truncf %28 : vector<16x128xf32> to vector<16x128xbf16>
    %cst_20 = arith.constant dense<0.000000e+00> : vector<16x384xf32>
    %30 = tpu.matmul %29, %1, %cst_20 {dimension_numbers = #tpu.dot_dimension_numbers<[1], [0], [0], [1], [0, 0, 1, 1], [], []>} : vector<16x128xbf16>, vector<128x384xbf16>, vector<16x384xf32> -> vector<16x384xf32>
    %31 = vector.extract_strided_slice %29 {offsets = [0, 0], sizes = [8, 128], strides = [1, 1]} : vector<16x128xbf16> to vector<8x128xbf16>
    %32 = vector.extract_strided_slice %2 {offsets = [0, 0, 0], sizes = [1, 8, 8], strides = [1, 1, 1]} : vector<4x8x8xbf16> to vector<1x8x8xbf16>
    %33 = vector.shape_cast %32 : vector<1x8x8xbf16> to vector<8x8xbf16>
    %cst_21 = arith.constant dense<0.000000e+00> : vector<8x128xf32>
    %34 = tpu.matmul %33, %31, %cst_21 {dimension_numbers = #tpu.dot_dimension_numbers<[1], [0], [0], [1], [0, 0, 1, 1], [], []>} : vector<8x8xbf16>, vector<8x128xbf16>, vector<8x128xf32> -> vector<8x128xf32>
    %35 = arith.addf %34, %9 : vector<8x128xf32>
    %36 = vector.extract_strided_slice %30 {offsets = [0, 0], sizes = [8, 128], strides = [1, 1]} : vector<16x384xf32> to vector<8x128xf32>
    %37 = arith.truncf %36 : vector<8x128xf32> to vector<8x128xbf16>
    %38 = vector.extract_strided_slice %2 {offsets = [1, 0, 0], sizes = [1, 8, 8], strides = [1, 1, 1]} : vector<4x8x8xbf16> to vector<1x8x8xbf16>
    %39 = vector.shape_cast %38 : vector<1x8x8xbf16> to vector<8x8xbf16>
    %cst_22 = arith.constant dense<0.000000e+00> : vector<8x128xf32>
    %40 = tpu.matmul %39, %37, %cst_22 {dimension_numbers = #tpu.dot_dimension_numbers<[1], [0], [0], [1], [0, 0, 1, 1], [], []>} : vector<8x8xbf16>, vector<8x128xbf16>, vector<8x128xf32> -> vector<8x128xf32>
    %41 = arith.addf %35, %40 : vector<8x128xf32>
    %42 = vector.extract_strided_slice %30 {offsets = [0, 128], sizes = [8, 128], strides = [1, 1]} : vector<16x384xf32> to vector<8x128xf32>
    %43 = arith.truncf %42 : vector<8x128xf32> to vector<8x128xbf16>
    %44 = vector.extract_strided_slice %2 {offsets = [2, 0, 0], sizes = [1, 8, 8], strides = [1, 1, 1]} : vector<4x8x8xbf16> to vector<1x8x8xbf16>
    %45 = vector.shape_cast %44 : vector<1x8x8xbf16> to vector<8x8xbf16>
    %cst_23 = arith.constant dense<0.000000e+00> : vector<8x128xf32>
    %46 = tpu.matmul %45, %43, %cst_23 {dimension_numbers = #tpu.dot_dimension_numbers<[1], [0], [0], [1], [0, 0, 1, 1], [], []>} : vector<8x8xbf16>, vector<8x128xbf16>, vector<8x128xf32> -> vector<8x128xf32>
    %47 = arith.addf %41, %46 : vector<8x128xf32>
    %48 = vector.extract_strided_slice %30 {offsets = [0, 256], sizes = [8, 128], strides = [1, 1]} : vector<16x384xf32> to vector<8x128xf32>
    %49 = arith.truncf %48 : vector<8x128xf32> to vector<8x128xbf16>
    %50 = vector.extract_strided_slice %2 {offsets = [3, 0, 0], sizes = [1, 8, 8], strides = [1, 1, 1]} : vector<4x8x8xbf16> to vector<1x8x8xbf16>
    %51 = vector.shape_cast %50 : vector<1x8x8xbf16> to vector<8x8xbf16>
    %cst_24 = arith.constant dense<0.000000e+00> : vector<8x128xf32>
    %52 = tpu.matmul %51, %49, %cst_24 {dimension_numbers = #tpu.dot_dimension_numbers<[1], [0], [0], [1], [0, 0, 1, 1], [], []>} : vector<8x8xbf16>, vector<8x128xbf16>, vector<8x128xf32> -> vector<8x128xf32>
    %53 = arith.addf %47, %52 : vector<8x128xf32>
    %cst_25 = arith.constant 0.000000e+00 : f32
    %54 = vector.broadcast %cst_25 : f32 to vector<8x128xf32>
    %55 = arith.maximumf %53, %54 : vector<8x128xf32>
    %56 = arith.truncf %55 : vector<8x128xf32> to vector<8x128xbf16>
    %cst_26 = arith.constant dense<0.000000e+00> : vector<8x128xf32>
    %57 = tpu.matmul %3, %56, %cst_26 {dimension_numbers = #tpu.dot_dimension_numbers<[1], [0], [0], [1], [0, 0, 1, 1], [], []>} : vector<8x8xbf16>, vector<8x128xbf16>, vector<8x128xf32> -> vector<8x128xf32>
    %58 = arith.addf %57, %15 : vector<8x128xf32>
    %cst_27 = arith.constant 0.000000e+00 : f32
    %59 = vector.broadcast %cst_27 : f32 to vector<8x128xf32>
    %60 = arith.maximumf %58, %59 : vector<8x128xf32>
    %c0_28 = arith.constant 0 : index
    %c0_29 = arith.constant 0 : index
    %c0_30 = arith.constant 0 : index
    %61 = vector.load %arg8[%c0_28, %c0_29, %c0_30] : memref<2x8x128xf32, #tpu.memory_space<vmem>>, vector<1x8x128xf32>
    %62 = vector.shape_cast %61 : vector<1x8x128xf32> to vector<8x128xf32>
    %63 = vector.shape_cast %60 : vector<8x128xf32> to vector<1x8x128xf32>
    tpu.vector_store %arg8[%c0_28, %c0_29, %c0_30], %63 {strides = array<i32>} : memref<2x8x128xf32, #tpu.memory_space<vmem>>, vector<1x8x128xf32>,
    %64 = vector.extract_strided_slice %29 {offsets = [8, 0], sizes = [8, 128], strides = [1, 1]} : vector<16x128xbf16> to vector<8x128xbf16>
    %65 = vector.extract_strided_slice %2 {offsets = [0, 0, 0], sizes = [1, 8, 8], strides = [1, 1, 1]} : vector<4x8x8xbf16> to vector<1x8x8xbf16>
    %66 = vector.shape_cast %65 : vector<1x8x8xbf16> to vector<8x8xbf16>
    %cst_31 = arith.constant dense<0.000000e+00> : vector<8x128xf32>
    %67 = tpu.matmul %66, %64, %cst_31 {dimension_numbers = #tpu.dot_dimension_numbers<[1], [0], [0], [1], [0, 0, 1, 1], [], []>} : vector<8x8xbf16>, vector<8x128xbf16>, vector<8x128xf32> -> vector<8x128xf32>
    %68 = arith.addf %67, %9 : vector<8x128xf32>
    %69 = vector.extract_strided_slice %30 {offsets = [8, 0], sizes = [8, 128], strides = [1, 1]} : vector<16x384xf32> to vector<8x128xf32>
    %70 = arith.truncf %69 : vector<8x128xf32> to vector<8x128xbf16>
    %71 = vector.extract_strided_slice %2 {offsets = [1, 0, 0], sizes = [1, 8, 8], strides = [1, 1, 1]} : vector<4x8x8xbf16> to vector<1x8x8xbf16>
    %72 = vector.shape_cast %71 : vector<1x8x8xbf16> to vector<8x8xbf16>
    %cst_32 = arith.constant dense<0.000000e+00> : vector<8x128xf32>
    %73 = tpu.matmul %72, %70, %cst_32 {dimension_numbers = #tpu.dot_dimension_numbers<[1], [0], [0], [1], [0, 0, 1, 1], [], []>} : vector<8x8xbf16>, vector<8x128xbf16>, vector<8x128xf32> -> vector<8x128xf32>
    %74 = arith.addf %68, %73 : vector<8x128xf32>
    %75 = vector.extract_strided_slice %30 {offsets = [8, 128], sizes = [8, 128], strides = [1, 1]} : vector<16x384xf32> to vector<8x128xf32>
    %76 = arith.truncf %75 : vector<8x128xf32> to vector<8x128xbf16>
    %77 = vector.extract_strided_slice %2 {offsets = [2, 0, 0], sizes = [1, 8, 8], strides = [1, 1, 1]} : vector<4x8x8xbf16> to vector<1x8x8xbf16>
    %78 = vector.shape_cast %77 : vector<1x8x8xbf16> to vector<8x8xbf16>
    %cst_33 = arith.constant dense<0.000000e+00> : vector<8x128xf32>
    %79 = tpu.matmul %78, %76, %cst_33 {dimension_numbers = #tpu.dot_dimension_numbers<[1], [0], [0], [1], [0, 0, 1, 1], [], []>} : vector<8x8xbf16>, vector<8x128xbf16>, vector<8x128xf32> -> vector<8x128xf32>
    %80 = arith.addf %74, %79 : vector<8x128xf32>
    %81 = vector.extract_strided_slice %30 {offsets = [8, 256], sizes = [8, 128], strides = [1, 1]} : vector<16x384xf32> to vector<8x128xf32>
    %82 = arith.truncf %81 : vector<8x128xf32> to vector<8x128xbf16>
    %83 = vector.extract_strided_slice %2 {offsets = [3, 0, 0], sizes = [1, 8, 8], strides = [1, 1, 1]} : vector<4x8x8xbf16> to vector<1x8x8xbf16>
    %84 = vector.shape_cast %83 : vector<1x8x8xbf16> to vector<8x8xbf16>
    %cst_34 = arith.constant dense<0.000000e+00> : vector<8x128xf32>
    %85 = tpu.matmul %84, %82, %cst_34 {dimension_numbers = #tpu.dot_dimension_numbers<[1], [0], [0], [1], [0, 0, 1, 1], [], []>} : vector<8x8xbf16>, vector<8x128xbf16>, vector<8x128xf32> -> vector<8x128xf32>
    %86 = arith.addf %80, %85 : vector<8x128xf32>
    %cst_35 = arith.constant 0.000000e+00 : f32
    %87 = vector.broadcast %cst_35 : f32 to vector<8x128xf32>
    %88 = arith.maximumf %86, %87 : vector<8x128xf32>
    %89 = arith.truncf %88 : vector<8x128xf32> to vector<8x128xbf16>
    %cst_36 = arith.constant dense<0.000000e+00> : vector<8x128xf32>
    %90 = tpu.matmul %3, %89, %cst_36 {dimension_numbers = #tpu.dot_dimension_numbers<[1], [0], [0], [1], [0, 0, 1, 1], [], []>} : vector<8x8xbf16>, vector<8x128xbf16>, vector<8x128xf32> -> vector<8x128xf32>
    %91 = arith.addf %90, %24 : vector<8x128xf32>
    %cst_37 = arith.constant 0.000000e+00 : f32
    %92 = vector.broadcast %cst_37 : f32 to vector<8x128xf32>
    %93 = arith.maximumf %91, %92 : vector<8x128xf32>
    %c1_38 = arith.constant 1 : index
    %c0_39 = arith.constant 0 : index
    %c0_40 = arith.constant 0 : index
    %94 = vector.load %arg8[%c1_38, %c0_39, %c0_40] : memref<2x8x128xf32, #tpu.memory_space<vmem>>, vector<1x8x128xf32>
    %95 = vector.shape_cast %94 : vector<1x8x128xf32> to vector<8x128xf32>
    %96 = vector.shape_cast %93 : vector<8x128xf32> to vector<1x8x128xf32>
    tpu.vector_store %arg8[%c1_38, %c0_39, %c0_40], %96 {strides = array<i32>} : memref<2x8x128xf32, #tpu.memory_space<vmem>>, vector<1x8x128xf32>,
    return
  }
  func.func @transform_0(%arg0: i32) -> (i32, i32, i32) {
    %c0_i32 = arith.constant 0 : i32
    %c0_i32_0 = arith.constant 0 : i32
    %c0_i32_1 = arith.constant 0 : i32
    return %arg0, %c0_i32, %c0_i32_0 : i32, i32, i32
  }
  func.func @transform_1(%arg0: i32) -> (i32, i32) {
    %c0_i32 = arith.constant 0 : i32
    %c0_i32_0 = arith.constant 0 : i32
    %c0_i32_1 = arith.constant 0 : i32
    return %c0_i32, %c0_i32_0 : i32, i32
  }
  func.func @transform_2(%arg0: i32) -> (i32, i32) {
    %c0_i32 = arith.constant 0 : i32
    %c0_i32_0 = arith.constant 0 : i32
    %c0_i32_1 = arith.constant 0 : i32
    return %c0_i32, %c0_i32_0 : i32, i32
  }
  func.func @transform_3(%arg0: i32) -> (i32, i32) {
    %c0_i32 = arith.constant 0 : i32
    %c0_i32_0 = arith.constant 0 : i32
    %c0_i32_1 = arith.constant 0 : i32
    return %c0_i32, %c0_i32_0 : i32, i32
  }
  func.func @transform_4(%arg0: i32) -> (i32, i32, i32) {
    %c0_i32 = arith.constant 0 : i32
    %c0_i32_0 = arith.constant 0 : i32
    %c0_i32_1 = arith.constant 0 : i32
    %c0_i32_2 = arith.constant 0 : i32
    return %c0_i32, %c0_i32_0, %c0_i32_1 : i32, i32, i32
  }
  func.func @transform_5(%arg0: i32) -> (i32, i32) {
    %c0_i32 = arith.constant 0 : i32
    %c0_i32_0 = arith.constant 0 : i32
    %c0_i32_1 = arith.constant 0 : i32
    return %c0_i32, %c0_i32_0 : i32, i32
  }
  func.func @transform_6(%arg0: i32) -> (i32, i32) {
    %c0_i32 = arith.constant 0 : i32
    %c0_i32_0 = arith.constant 0 : i32
    %c0_i32_1 = arith.constant 0 : i32
    return %c0_i32, %c0_i32_0 : i32, i32
  }
  func.func @transform_7(%arg0: i32) -> (i32, i32, i32) {
    %c0_i32 = arith.constant 0 : i32
    %c0_i32_0 = arith.constant 0 : i32
    %c0_i32_1 = arith.constant 0 : i32
    return %arg0, %c0_i32, %c0_i32_0 : i32, i32, i32
  }
}

</mosaic_0001>

<bundles_post_ra>
// kernel: tpu_custom_call.1
= control target key start
LH: loop header
LB: loop body
LE: loop exit
PB: predicated region body
PF: predicated region fallthrough
CT: control target
= control target key end

     0   :  { %12 = vsyncpa [#allocation3], 0  ;;  %s1673_s0 = inlined_call_operand.hbm [shape: f32[2,4,162], index: 0, kind: input, shape index: {}]   ;;  %s1674_s1 = inlined_call_operand.hbm [shape: bf16[16,4], index: 1, kind: input, shape index: {}]   ;;  %s1675_s2 = inlined_call_operand.hbm [shape: f32[16,1], index: 2, kind: input, shape index: {}]   ;;  %s1676_s3 = inlined_call_operand.hbm [shape: bf16[128,384], index: 3, kind: input, shape index: {}]   ;;  %s1677_s4 = inlined_call_operand.hbm [shape: bf16[4,8,8], index: 4, kind: input, shape index: {}]   ;;  %s1678_s5 = inlined_call_operand.hbm [shape: f32[8,1], index: 5, kind: input, shape index: {}]   ;;  %s1679_s6 = inlined_call_operand.hbm [shape: bf16[8,8], index: 6, kind: input, shape index: {}]   ;;  %s1680_s7 = inlined_call_operand.hbm [shape: f32[2,8,128], index: 7, kind: output, shape index: {}]  }
   0x1   :  { %13 = vsyncpa [#allocation6], 0 }
   0x2   :  { %14 = vsyncpa [#allocation9], 0 }
   0x3   :  { %15 = vsyncpa [#allocation12], 0 }
   0x4   :  { %16 = vsyncpa [#allocation4], 0  ;;  %s1410_s24 = smov [#allocation5]   ;;  %s1411_s26 = smov [#allocation8]  }
   0x5   :  { %s34_s25 = sshll.u32 %s1410_s24, 4  ;;  %s58_s27 = sshll.u32 %s1411_s26, 4  ;;  %s35_s25 = int_to_ptr.vmem [resolvable:$true] %s34_s25  ;;  %s1467_s27 = int_to_ptr.vmem [resolvable:$true] %s58_s27 }
   0x6   :  { %s1224_s30 = scalar_lea.hbm %s1674_s1, 128 }
   0x7   :  { %p1225_p0 = scmp.ne.s32.totalorder %s1674_s1, %s1224_s30  ;;  %p1228_p1 = scmp.lt.u32.totalorder %s1224_s30, %s1674_s1 }
   0x9   :  { %p1230_p2 = pnand %p1228_p1, %p1225_p0 }
   0xb   :  { %1233 = shalt.err (!%p1230_p2)
}
   0xc   :  { %s1234_s12 = scalar_lea.vmem %s35_s25, 128  ;;  %p1239_p4 = scmp.lt.s32.totalorder %s35_s25, %s35_s25 }
   0xd   :  { %p1235_p3 = scmp.ne.s32.totalorder %s35_s25, %s1234_s12  ;;  %p1240_p5 = scmp.lt.s32.totalorder %s1234_s12, %s1234_s12 }
   0xf   :  { %p1241_p6 = por %p1240_p5, %p1239_p4 }
  0x11   :  { %p1242_p7 = pnand %p1241_p6, %p1235_p3 }
  0x13   :  { %1245 = shalt.err (!%p1242_p7)
}
  0x14   :  { %s1412_s13 = smov 64   ;;  %s1413_s14 = smov 4  }
  0x15   :  { %40 = dma.hbm_to_vmem [thread:$0]  %s1674_s1, 128, %s35_s25, [#allocation6], %s1412_s13, %s1412_s13, %s1413_s14  }
  0x16   :  { %s1246_s19 = scalar_lea.hbm %s1676_s3, 3072 }
  0x17   :  { %p1247_p8 = scmp.ne.s32.totalorder %s1676_s3, %s1246_s19  ;;  %p1250_p9 = scmp.lt.u32.totalorder %s1246_s19, %s1676_s3 }
  0x19   :  { %p1252_p10 = pnand %p1250_p9, %p1247_p8 }
  0x1b   :  { %1255 = shalt.err (!%p1252_p10)
}
  0x1c   :  { %s1256_s24 = scalar_lea.vmem %s1467_s27, 3072  ;;  %p1261_p12 = scmp.lt.s32.totalorder %s1467_s27, %s1467_s27 }
  0x1d   :  { %p1257_p11 = scmp.ne.s32.totalorder %s1467_s27, %s1256_s24  ;;  %p1262_p13 = scmp.lt.s32.totalorder %s1256_s24, %s1256_s24 }
  0x1f   :  { %p1263_p0 = por %p1262_p13, %p1261_p12 }
  0x21   :  { %p1264_p1 = pnand %p1263_p0, %p1257_p11 }
  0x23   :  { %1267 = shalt.err (!%p1264_p1)
}
  0x24   :  { %s1414_s1 = smov 192   ;;  %s1415_s25 = smov 12  }
  0x25   :  { %64 = dma.hbm_to_vmem [thread:$0]  %s1676_s3, 3072, %s1467_s27, [#allocation9], %s1414_s1, %s1414_s1, %s1415_s25  }
  0x26   :  { %s1416_s29 = smov [#allocation11]   ;;  %s1417_s8 = smov [#allocation2]  }
  0x27   :  { %s83_s30 = sshll.u32 %s1416_s29, 4  ;;  %s22_s9 = sshll.u32 %s1417_s8, 4  ;;  %s84_s30 = int_to_ptr.vmem [resolvable:$true] %s83_s30  ;;  %s1501_s9 = int_to_ptr.vmem [resolvable:$true] %s22_s9 }
  0x28   :  { %s1268_s12 = scalar_lea.hbm %s1678_s5, 128 }
  0x29   :  { %p1269_p2 = scmp.ne.s32.totalorder %s1678_s5, %s1268_s12  ;;  %p1272_p3 = scmp.lt.u32.totalorder %s1268_s12, %s1678_s5 }
  0x2b   :  { %p1274_p4 = pnand %p1272_p3, %p1269_p2 }
  0x2d   :  { %1277 = shalt.err (!%p1274_p4)
}
  0x2e   :  { %s1278_s3 = scalar_lea.vmem %s84_s30, 128  ;;  %p1283_p6 = scmp.lt.s32.totalorder %s84_s30, %s84_s30 }
  0x2f   :  { %p1279_p5 = scmp.ne.s32.totalorder %s84_s30, %s1278_s3  ;;  %p1284_p7 = scmp.lt.s32.totalorder %s1278_s3, %s1278_s3 }
  0x31   :  { %p1285_p8 = por %p1284_p7, %p1283_p6 }
  0x33   :  { %p1286_p9 = pnand %p1285_p8, %p1279_p5 }
  0x35   :  { %1289 = shalt.err (!%p1286_p9)
}
  0x36   :  { %86 = dma.hbm_to_vmem [thread:$0]  %s1678_s5, 128, %s84_s30, [#allocation12]  }
  0x37   :  { %s1290_s22 = scalar_lea.hbm %s1673_s0, 128  ;;  %s1292_s26 = scalar_lea.hbm %s1673_s0, 256 }
  0x38   :  { %p1291_p10 = scmp.ne.s32.totalorder %s1673_s0, %s1290_s22  ;;  %p1293_p11 = scmp.lt.u32.totalorder %s1292_s26, %s1290_s22 }
  0x39   :  { %p1294_p12 = scmp.lt.u32.totalorder %s1290_s22, %s1673_s0 }
  0x3b   :  { %p1295_p13 = por %p1294_p12, %p1293_p11 }
  0x3d   :  { %p1296_p0 = pnand %p1295_p13, %p1291_p10 }
  0x3f   :  { %1299 = shalt.err (!%p1296_p0)
}
  0x40   :  { %s1300_s5 = scalar_lea.vmem %s1501_s9, 128  ;;  %p1305_p2 = scmp.lt.s32.totalorder %s1501_s9, %s1501_s9 }
  0x41   :  { %p1301_p1 = scmp.ne.s32.totalorder %s1501_s9, %s1300_s5  ;;  %p1306_p3 = scmp.lt.s32.totalorder %s1300_s5, %s1300_s5 }
  0x43   :  { %p1307_p4 = por %p1306_p3, %p1305_p2 }
  0x45   :  { %p1308_p5 = pnand %p1307_p4, %p1301_p1 }
  0x47   :  { %1311 = shalt.err (!%p1308_p5)
}
  0x48   :  { %s1418_s30 = smov 128   ;;  %s1419_s11 = smov [#allocation7]  }
  0x49   :  { %28 = dma.hbm_to_vmem [thread:$0]  %s1673_s0, 128, %s1501_s9, [#allocation3], %s1418_s30, %s1412_s13, %s1413_s14  }
  0x4a   :  { %s46_s12 = sshll.u32 %s1419_s11, 4  ;;  %s1312_s17 = scalar_lea.hbm %s1675_s2, 256  ;;  %s47_s12 = int_to_ptr.vmem [resolvable:$true] %s46_s12 }
  0x4b   :  { %p1313_p6 = scmp.ne.s32.totalorder %s1675_s2, %s1312_s17  ;;  %p1316_p7 = scmp.lt.u32.totalorder %s1312_s17, %s1675_s2 }
  0x4d   :  { %p1318_p8 = pnand %p1316_p7, %p1313_p6 }
  0x4f   :  { %1321 = shalt.err (!%p1318_p8)
}
  0x50   :  { %s1322_s20 = scalar_lea.vmem %s47_s12, 256  ;;  %p1327_p10 = scmp.lt.s32.totalorder %s47_s12, %s47_s12 }
  0x51   :  { %p1323_p9 = scmp.ne.s32.totalorder %s47_s12, %s1322_s20  ;;  %p1328_p11 = scmp.lt.s32.totalorder %s1322_s20, %s1322_s20 }
  0x53   :  { %p1329_p12 = por %p1328_p11, %p1327_p10 }
  0x55   :  { %p1330_p13 = pnand %p1329_p12, %p1323_p9 }
  0x57   :  { %1333 = shalt.err (!%p1330_p13)
}
  0x58   :  { %s1420_s0 = smov 8   ;;  %s1421_s22 = smov [#allocation10]  }
  0x59   :  { %52 = dma.hbm_to_vmem [thread:$0]  %s1675_s2, 256, %s47_s12, [#allocation6], %s1418_s30, %s1418_s30, %s1420_s0  }
  0x5a   :  { %s70_s23 = sshll.u32 %s1421_s22, 4  ;;  %s1422_s24 = smov [#allocation13]   ;;  %s71_s23 = int_to_ptr.vmem [resolvable:$true] %s70_s23 }
  0x5b   :  { %s93_s1 = sshll.u32 %s1422_s24, 4  ;;  %s1334_s28 = scalar_lea.hbm %s1677_s4, 256  ;;  %s94_s1 = int_to_ptr.vmem [resolvable:$true] %s93_s1 }
  0x5c   :  { %p1335_p0 = scmp.ne.s32.totalorder %s1677_s4, %s1334_s28  ;;  %p1338_p1 = scmp.lt.u32.totalorder %s1334_s28, %s1677_s4 }
  0x5e   :  { %p1340_p2 = pnand %p1338_p1, %p1335_p0 }
  0x60   :  { %1343 = shalt.err (!%p1340_p2)
}
  0x61   :  { %s1344_s2 = scalar_lea.vmem %s71_s23, 256  ;;  %p1349_p4 = scmp.lt.s32.totalorder %s71_s23, %s71_s23 }
  0x62   :  { %p1345_p3 = scmp.ne.s32.totalorder %s71_s23, %s1344_s2  ;;  %p1350_p5 = scmp.lt.s32.totalorder %s1344_s2, %s1344_s2 }
  0x64   :  { %p1351_p6 = por %p1350_p5, %p1349_p4 }
  0x66   :  { %p1352_p7 = pnand %p1351_p6, %p1345_p3 }
  0x68   :  { %1355 = shalt.err (!%p1352_p7)
}
  0x69   :  { %76 = dma.hbm_to_vmem [thread:$0]  %s1677_s4, 256, %s71_s23, [#allocation9], %s1412_s13, %s1412_s13, %s1413_s14  }
  0x6a   :  { %s1356_s17 = scalar_lea.hbm %s1679_s6, 64 }
  0x6b   :  { %p1357_p8 = scmp.ne.s32.totalorder %s1679_s6, %s1356_s17  ;;  %p1360_p9 = scmp.lt.u32.totalorder %s1356_s17, %s1679_s6 }
  0x6d   :  { %p1362_p10 = pnand %p1360_p9, %p1357_p8 }
  0x6f   :  { %1365 = shalt.err (!%p1362_p10)
}
  0x70   :  { %s1366_s20 = scalar_lea.vmem %s94_s1, 64  ;;  %p1371_p12 = scmp.lt.s32.totalorder %s94_s1, %s94_s1 }
  0x71   :  { %p1367_p11 = scmp.ne.s32.totalorder %s94_s1, %s1366_s20  ;;  %p1372_p13 = scmp.lt.s32.totalorder %s1366_s20, %s1366_s20 }
  0x73   :  { %p1373_p0 = por %p1372_p13, %p1371_p12 }
  0x75   :  { %p1374_p1 = pnand %p1373_p0, %p1367_p11 }
  0x77   :  { %1377 = shalt.err (!%p1374_p1)
}
  0x78   :  { %96 = dma.hbm_to_vmem [thread:$0]  %s1679_s6, 64, %s94_s1, [#allocation12]  }
  0x79   :  { %1400 = dma.done.wait [#allocation3], 128  }
  0x7a   :  { %1401 = vsyncadd [#allocation3], 4294967168 }
  0x7b   :  { %1402 = dma.done.wait [#allocation6], 384  }
  0x7c   :  { %1403 = vsyncadd [#allocation6], 4294966912 }
  0x7d   :  { %1404 = dma.done.wait [#allocation9], 3328  }
  0x7e   :  { %1405 = vsyncadd [#allocation9], 4294963968 }
  0x7f   :  { %1406 = dma.done.wait [#allocation12], 192  }
  0x80   :  { %1407 = vsyncadd [#allocation12], 4294967104  ;;  %v1423_v0 = vmov 0.0   ;;  %vm1424_vm0 = vmmov 0   ;;  %v1425_v1 = vmov 0   ;;  %vm187_vm1 = vcmask 1041408  }
  0x81   :  { %1054 = vmatprep.subr.bf16.mxu0 %v1423_v0  ;;  %1060 = vmatprep.subr.bf16.mxu1 %v1423_v0  ;;  %v176_v2 = vld [vmem:[#allocation2] sm:$0xf]  ;;  %v234_v3 = vld [vmem:[#allocation2 + $0x4] sm:$0xf]  ;;  %v1191_v6 = vld [vmem:[#allocation5] sm:$0xff]   ;;  %vm183_vm2 = vcmask 31744  }
  0x82   :  { %1056 = vmatprep.mubr.msk.bf16.mxu0 %vm1424_vm0, %v1423_v0  ;;  %1062 = vmatprep.mubr.msk.bf16.mxu1 %vm1424_vm0, %v1423_v0  ;;  %v177_v4 = vpack.c.bf16 %v176_v2, %v176_v2  ;;  %v235_v5 = vpack.c.bf16 %v234_v3, %v234_v3  ;;  %v159_v7 = vld [vmem:[#allocation7 + $0x8] sm:$0xff]  ;;  %v158_v8 = vld [vmem:[#allocation7] sm:$0xff]  ;;  %v1192_v12 = vld [vmem:[#allocation8] ss:$12 sps:$4 sm:$0xff]   ;;  %vm498_vm3 = vcmask 1043456   ;;  %vm494_vm4 = vcmask 64512  }
  0x83   :  { %1189 = vset.pattern.permute.xlu0 %v1425_v1  ;;  %1190 = vset.pattern.permute.xlu1 %v1425_v1  ;;  %v170_v9 = vld [vmem:[#allocation11] sm:$0xff]  ;;  %v1198_v15 = vld [vmem:[#allocation8 + $0x1c] ss:$12 sps:$4 sm:$0xff]   ;;  %v1196_v16 = vld [vmem:[#allocation8 + $0x18] ss:$12 sps:$4 sm:$0xff]   ;;  %s1426_s6 = smov [#allocation14]  }
  0x84   :  { %167 = vperm.xlu0 %1189, %v159_v7   ;;  %v189_v10 = vsel %vm187_vm1, %v177_v4, 0  ;;  %v237_v11 = vsel %vm187_vm1, %v235_v5, 0  ;;  %162 = vperm.xlu1 %1190, %v158_v8   ;;  %v1194_v13 = vld [vmem:[#allocation8 + $0x4] ss:$12 sps:$4 sm:$0xff]   ;;  %v1195_v14 = vld [vmem:[#allocation8 + $0x8] ss:$12 sps:$4 sm:$0xff]  }
  0x85   :  { %1055 = vmatpush3.bf16.msra.mxu0 %v189_v10  ;;  %1061 = vmatpush3.bf16.msra.mxu1 %v237_v11  ;;  %v1199_v17 = vld [vmem:[#allocation8 + $0x20] ss:$12 sps:$4 sm:$0xff]   ;;  %v1200_v19 = vld [vmem:[#allocation8 + $0x30] ss:$12 sps:$4 sm:$0xff]   ;;  %v1203_v20 = vld [vmem:[#allocation8 + $0x38] ss:$12 sps:$4 sm:$0xff]  }
  0x86   :  { %1066 = vmatprep.subr.bf16.mxu1 %v1423_v0  ;;  %410 = vmatprep.subr.bf16.mxu0 %v1194_v13  ;;  %v1202_v18 = vld [vmem:[#allocation8 + $0x34] ss:$12 sps:$4 sm:$0xff]   ;;  %v1206_v21 = vld [vmem:[#allocation8 + $0x4c] ss:$12 sps:$4 sm:$0xff]   ;;  %v1207_v23 = vld [vmem:[#allocation8 + $0x50] ss:$12 sps:$4 sm:$0xff]  }
  0x87   :  { %v1204_v22 = vld [vmem:[#allocation8 + $0x48] ss:$12 sps:$4 sm:$0xff]   ;;  %v1210_v24 = vld [vmem:[#allocation8 + $0x64] ss:$12 sps:$4 sm:$0xff]   ;;  %v1208_v25 = vld [vmem:[#allocation8 + $0x60] ss:$12 sps:$4 sm:$0xff]  }
  0x88   :  { %173 = vperm.xlu0 %1189, %v170_v9   ;;  %1057 = vmatmul.mubr.msk.bf16.vlgmr.msra.gmra.mrb[0].mxu0 %vm183_vm2, %v1191_v6  ;;  %v1211_v26 = vld [vmem:[#allocation8 + $0x68] ss:$12 sps:$4 sm:$0xff]   ;;  %v1212_v28 = vld [vmem:[#allocation8 + $0x78] ss:$12 sps:$4 sm:$0xff]   ;;  %v1215_v29 = vld [vmem:[#allocation8 + $0x80] ss:$12 sps:$4 sm:$0xff]  }
  0x89   :  { %1063 = vmatmul.mubr.msk.bf16.vlgmr.msra.gmra.mrb[0].mxu1 %vm183_vm2, %v1191_v6  ;;  %411 = vmatpush1.bf16.msra.mxu0 %v1192_v12  ;;  %v1214_v27 = vld [vmem:[#allocation8 + $0x7c] ss:$12 sps:$4 sm:$0xff]   ;;  %v1218_v30 = vld [vmem:[#allocation8 + $0x94] ss:$12 sps:$4 sm:$0xff]   ;;  %v1219_v32 = vld [vmem:[#allocation8 + $0x98] ss:$12 sps:$4 sm:$0xff]  }
  0x8a   :  { %1067 = vmatpush3.bf16.msra.mxu1 %v1195_v14  ;;  %412 = vmatprep.subr.bf16.mxu0 %v1198_v15  ;;  %v1216_v31 = vld [vmem:[#allocation8 + $0x90] ss:$12 sps:$4 sm:$0xff]   ;;  %v1222_v33 = vld [vmem:[#allocation8 + $0xac] ss:$12 sps:$4 sm:$0xff]   ;;  %v1220_v34 = vld [vmem:[#allocation8 + $0xa8] ss:$12 sps:$4 sm:$0xff]  }
  0x8b   :  { %1068 = vmatprep.subr.bf16.mxu1 %v1423_v0  ;;  %442 = vmatprep.mubr.bf16.mxu0 %v1425_v1  ;;  %v1223_v35 = vld [vmem:[#allocation8 + $0xb0] ss:$12 sps:$4 sm:$0xff]   ;;  %v153_v53 = vld [vmem:[#allocation10] sm:$0xf]  ;;  %v154_v2 = vld [vmem:[#allocation10 + $0x4] sm:$0xf] }
  0x8c   :  { %1082 = vmatprep.mubr.msk.bf16.mxu1 %vm1424_vm0, %v1423_v0  ;;  %v155_v5 = vld [vmem:[#allocation10 + $0x8] sm:$0xf]  ;;  %v156_v7 = vld [vmem:[#allocation10 + $0xc] sm:$0xf]  ;;  %s969_s14 = sshll.u32 %s1426_s6, 4  ;;  %s970_s14 = int_to_ptr.vmem [resolvable:$true] %s969_s14 }
  0x8d   :  { %413 = vmatpush1.bf16.msra.mxu0 %v1196_v16  ;;  %s1378_s9 = scalar_lea.vmem %s970_s14, 256  ;;  %p1383_p3 = scmp.lt.s32.totalorder %s970_s14, %s970_s14 }
  0x8e   :  { %1069 = vmatpush3.bf16.msra.mxu1 %v1199_v17  ;;  %414 = vmatprep.subr.bf16.mxu0 %v1202_v18  ;;  %v157_v18 = vld [vmem:[#allocation13] sm:$0xf]  ;;  %p1379_p2 = scmp.ne.s32.totalorder %s970_s14, %s1378_s9  ;;  %p1384_p4 = scmp.lt.s32.totalorder %s1378_s9, %s1378_s9 }
  0x8f   :  { %1070 = vmatprep.subr.bf16.mxu1 %v1423_v0 }
  0x90   :  { %p1385_p5 = por %p1384_p4, %p1383_p3 }
  0x91   :  { %415 = vmatpush1.bf16.msra.mxu0 %v1200_v19 }
  0x92   :  { %1071 = vmatpush3.bf16.msra.mxu1 %v1203_v20  ;;  %416 = vmatprep.subr.bf16.mxu0 %v1206_v21  ;;  %p1386_p6 = pnand %p1385_p5, %p1379_p2 }
  0x93   :  { %1072 = vmatprep.subr.bf16.mxu1 %v1423_v0 }
  0x95   :  { %417 = vmatpush1.bf16.msra.mxu0 %v1204_v22 }
  0x96   :  { %1073 = vmatpush3.bf16.msra.mxu1 %v1207_v23  ;;  %418 = vmatprep.subr.bf16.mxu0 %v1210_v24 }
  0x97   :  { %1074 = vmatprep.subr.bf16.mxu1 %v1423_v0 }
  0x99   :  { %419 = vmatpush1.bf16.msra.mxu0 %v1208_v25 }
  0x9a   :  { %1075 = vmatpush3.bf16.msra.mxu1 %v1211_v26  ;;  %420 = vmatprep.subr.bf16.mxu0 %v1214_v27 }
  0x9b   :  { %1076 = vmatprep.subr.bf16.mxu1 %v1423_v0 }
  0x9d   :  { %421 = vmatpush1.bf16.msra.mxu0 %v1212_v28 }
  0x9e   :  { %1077 = vmatpush3.bf16.msra.mxu1 %v1215_v29  ;;  %422 = vmatprep.subr.bf16.mxu0 %v1218_v30 }
  0x9f   :  { %1078 = vmatprep.subr.bf16.mxu1 %v1423_v0 }
  0xa1   :  { %423 = vmatpush1.bf16.msra.mxu0 %v1216_v31 }
  0xa2   :  { %1079 = vmatpush3.bf16.msra.mxu1 %v1219_v32  ;;  %424 = vmatprep.subr.bf16.mxu0 %v1222_v33 }
  0xa3   :  { %1080 = vmatprep.subr.bf16.mxu1 %v1423_v0 }
  0xa5   :  { %425 = vmatpush1.bf16.msra.mxu0 %v1220_v34 }
  0xa6   :  { %1081 = vmatpush3.bf16.msra.mxu1 %v1223_v35  ;;  %1086 = vmatprep.subr.bf16.mxu0 %v1423_v0 }
  0xa7   :  { %1110 = vmatprep.subr.bf16.mxu1 %v1423_v0 }
 0x103   :  { %v1600_v36 = vpop.permute.xlu1 %162  ;;  %v168_v37 = vpop.permute.xlu0 %167 }
 0x107   :  { %v174_v8 = vpop.permute.xlu0 %173 }
 0x15b   :  { %v1602_v38 = vpop.f32.mrb[0].mxu0 }
 0x15c   :  { %v273_v39 = vpop.f32.mrb[0].mxu1  ;;  %v1058_v41 = vpop.f32.mrb[1].mxu0  ;;  %v226_v26 = vadd.f32 %v1602_v38, %v1600_v36 }
 0x15d   :  { %v1605_v40 = vadd.f32 %v273_v39, %v1600_v36  ;;  %v1064_v42 = vpop.f32.mrb[1].mxu1  ;;  %v228_v43 = vpop.f32.mrb[2].mxu0 }
 0x15e   :  { %v276_v44 = vpop.f32.mrb[2].mxu1  ;;  %v229_v45 = vadd.f32 %v228_v43, %v168_v37  ;;  %v1059_v47 = vpop.f32.mrb[3].mxu0 }
 0x15f   :  { %v277_v46 = vadd.f32 %v276_v44, %v168_v37  ;;  %v1065_v48 = vpop.f32.mrb[3].mxu1 }
 0x160   :  { %v232_v49 = vmax.f32 %v229_v45, 0.0 }
 0x161   :  { %v280_v50 = vmax.f32 %v277_v46, 0.0 }
 0x163   :  { %v281_v51 = vpack.c.bf16 %v280_v50, %v232_v49 }
 0x165   :  { %443 = vmatmul.mubr.bf16.vlgmr.msra.gmra.mrb[4].mxu0 %v281_v51  ;;  %1083 = vmatmul.mubr.bf16.vlgmr.msra.gmra.mrb[4].mxu1 %v281_v51  ;;  %v500_v52 = vsel %vm498_vm3, %v281_v51, 0  ;;  %v737_v17 = vrot.slane %v281_v51, 4 }
 0x166   :  { %1087 = vmatpush3.bf16.msra.mxu0 %v500_v52  ;;  %1088 = vmatprep.mubr.msk.bf16.mxu0 %vm1424_vm0, %v1423_v0 }
 0x167   :  { %1092 = vmatprep.subr.bf16.mxu0 %v1423_v0  ;;  %1112 = vmatprep.mubr.msk.bf16.mxu1 %vm1424_vm0, %v1423_v0  ;;  %v739_v19 = vsel %vm498_vm3, %v737_v17, 0 }
 0x16d   :  { %1089 = vmatmul.mubr.msk.bf16.vlgmr.msra.gmra.mrb[8].mxu0 %vm494_vm4, %v153_v53 }
 0x16e   :  { %1094 = vmatprep.mubr.msk.bf16.mxu0 %vm1424_vm0, %v1423_v0 }
 0x238   :  { %v444_v54 = vpop.f32.mrb[4].mxu0  ;;  %v487_v55 = vpop.f32.mrb[4].mxu1 }
 0x239   :  { %v542_v56 = vpack.c.bf16 %v444_v54, %v444_v54  ;;  %v446_v57 = vpop.f32.mrb[5].mxu0  ;;  %v1084_v58 = vpop.f32.mrb[5].mxu1  ;;  %v638_v4 = vpack.c.bf16 %v487_v55, %v487_v55 }
 0x23a   :  { %v448_v59 = vpop.f32.mrb[6].mxu0  ;;  %v490_v60 = vpop.f32.mrb[6].mxu1  ;;  %v590_v62 = vpack.c.bf16 %v446_v57, %v446_v57 }
 0x23b   :  { %v547_v61 = vsel %vm498_vm3, %v542_v56, 0  ;;  %v450_v63 = vpop.f32.mrb[7].mxu0  ;;  %v1085_v1 = vpop.f32.mrb[7].mxu1  ;;  %v643_v6 = vsel %vm498_vm3, %v638_v4, 0  ;;  %v781_v20 = vpack.c.bf16 %v448_v59, %v448_v59  ;;  %v871_v24 = vpack.c.bf16 %v490_v60, %v490_v60 }
 0x23c   :  { %1093 = vmatpush3.bf16.msra.mxu0 %v547_v61  ;;  %v595_v3 = vsel %vm498_vm3, %v590_v62, 0  ;;  %v826_v22 = vpack.c.bf16 %v450_v63, %v450_v63 }
 0x23d   :  { %1098 = vmatprep.subr.bf16.mxu0 %v1423_v0  ;;  %v783_v21 = vsel %vm498_vm3, %v781_v20, 0  ;;  %v873_v25 = vsel %vm498_vm3, %v871_v24, 0 }
 0x23e   :  { %v828_v23 = vsel %vm498_vm3, %v826_v22, 0 }
 0x23f   :  { %1095 = vmatmul.mubr.msk.bf16.vlgmr.msra.gmra.mrb[8].mxu0 %vm494_vm4, %v154_v2 }
 0x240   :  { %1099 = vmatpush3.bf16.msra.mxu0 %v595_v3  ;;  %1100 = vmatprep.mubr.msk.bf16.mxu0 %vm1424_vm0, %v1423_v0 }
 0x241   :  { %1104 = vmatprep.subr.bf16.mxu0 %v1423_v0 }
 0x24b   :  { %1101 = vmatmul.mubr.msk.bf16.vlgmr.msra.gmra.mrb[8].mxu0 %vm494_vm4, %v155_v5 }
 0x24c   :  { %1105 = vmatpush3.bf16.msra.mxu0 %v643_v6  ;;  %1106 = vmatprep.mubr.msk.bf16.mxu0 %vm1424_vm0, %v1423_v0 }
 0x24d   :  { %1140 = vmatprep.subr.bf16.mxu0 %v1423_v0 }
 0x257   :  { %1107 = vmatmul.mubr.msk.bf16.vlgmr.msra.gmra.mrb[8].mxu0 %vm494_vm4, %v156_v7 }
 0x258   :  { %1142 = vmatprep.mubr.msk.bf16.mxu0 %vm1424_vm0, %v1423_v0 }
 0x32a   :  { %v679_v9 = vpop.f32.mrb[8].mxu0 }
 0x32b   :  { %v1146_v10 = vadd.f32 %v679_v9, %v174_v8  ;;  %v1108_v11 = vpop.f32.mrb[9].mxu0 }
 0x32c   :  { %v682_v12 = vpop.f32.mrb[10].mxu0 }
 0x32d   :  { %v686_v13 = vmax.f32 %v1146_v10, 0.0  ;;  %v1109_v14 = vpop.f32.mrb[11].mxu0 }
 0x32f   :  { %v687_v15 = vpack.c.bf16 %v686_v13, %v686_v13 }
 0x331   :  { %v692_v16 = vsel %vm498_vm3, %v687_v15, 0 }
 0x332   :  { %1111 = vmatpush3.bf16.msra.mxu1 %v692_v16 }
 0x333   :  { %1116 = vmatprep.subr.bf16.mxu1 %v1423_v0 }
 0x335   :  { %1113 = vmatmul.mubr.msk.bf16.vlgmr.msra.gmra.mrb[8].mxu1 %vm494_vm4, %v157_v18 }
 0x336   :  { %1117 = vmatpush3.bf16.msra.mxu1 %v739_v19  ;;  %1118 = vmatprep.mubr.msk.bf16.mxu1 %vm1424_vm0, %v1423_v0 }
 0x337   :  { %1122 = vmatprep.subr.bf16.mxu1 %v1423_v0 }
 0x33d   :  { %1119 = vmatmul.mubr.msk.bf16.vlgmr.msra.gmra.mrb[12].mxu1 %vm494_vm4, %v153_v53 }
 0x33e   :  { %1123 = vmatpush3.bf16.msra.mxu1 %v783_v21  ;;  %1124 = vmatprep.mubr.msk.bf16.mxu1 %vm1424_vm0, %v1423_v0 }
 0x33f   :  { %1128 = vmatprep.subr.bf16.mxu1 %v1423_v0 }
 0x349   :  { %1125 = vmatmul.mubr.msk.bf16.vlgmr.msra.gmra.mrb[12].mxu1 %vm494_vm4, %v154_v2 }
 0x34a   :  { %1129 = vmatpush3.bf16.msra.mxu1 %v828_v23  ;;  %1130 = vmatprep.mubr.msk.bf16.mxu1 %vm1424_vm0, %v1423_v0 }
 0x34b   :  { %1134 = vmatprep.subr.bf16.mxu1 %v1423_v0 }
 0x355   :  { %1131 = vmatmul.mubr.msk.bf16.vlgmr.msra.gmra.mrb[12].mxu1 %vm494_vm4, %v155_v5 }
 0x356   :  { %1135 = vmatpush3.bf16.msra.mxu1 %v873_v25  ;;  %1136 = vmatprep.mubr.msk.bf16.mxu1 %vm1424_vm0, %v1423_v0 }
 0x361   :  { %1137 = vmatmul.mubr.msk.bf16.vlgmr.msra.gmra.mrb[12].mxu1 %vm494_vm4, %v156_v7 }
 0x408   :  { %v728_v27 = vpop.f32.mrb[8].mxu1 }
 0x409   :  { %v729_v28 = vadd.f32 %v728_v27, %v226_v26  ;;  %v1114_v29 = vpop.f32.mrb[9].mxu1 }
 0x40a   :  { %v731_v30 = vpop.f32.mrb[10].mxu1 }
 0x40b   :  { %v734_v31 = vmax.f32 %v729_v28, 0.0  ;;  %v1115_v32 = vpop.f32.mrb[11].mxu1 }
 0x40d   :  { %735 = vst [vmem:[#allocation14] sm:$0xff] %v734_v31 }
 0x434   :  { %v909_v33 = vpop.f32.mrb[12].mxu1 }
 0x435   :  { %v1147_v34 = vadd.f32 %v909_v33, %v174_v8  ;;  %v1138_v35 = vpop.f32.mrb[13].mxu1 }
 0x436   :  { %v912_v37 = vpop.f32.mrb[14].mxu1 }
 0x437   :  { %v916_v39 = vmax.f32 %v1147_v34, 0.0  ;;  %v1139_v41 = vpop.f32.mrb[15].mxu1 }
 0x439   :  { %v917_v42 = vpack.c.bf16 %v916_v39, %v916_v39 }
 0x43b   :  { %v919_v0 = vsel %vm498_vm3, %v917_v42, 0 }
 0x43c   :  { %1141 = vmatpush3.bf16.msra.mxu0 %v919_v0 }
 0x43f   :  { %1143 = vmatmul.mubr.msk.bf16.vlgmr.msra.gmra.mrb[12].mxu0 %vm494_vm4, %v157_v18 }
 0x512   :  { %v955_v36 = vpop.f32.mrb[12].mxu0 }
 0x513   :  { %v956_v38 = vadd.f32 %v955_v36, %v1605_v40  ;;  %v1144_v43 = vpop.f32.mrb[13].mxu0 }
 0x514   :  { %v958_v44 = vpop.f32.mrb[14].mxu0 }
 0x515   :  { %v961_v45 = vmax.f32 %v956_v38, 0.0  ;;  %v1145_v46 = vpop.f32.mrb[15].mxu0 }
 0x517   :  { %963 = vst [vmem:[#allocation14 + $0x8] sm:$0xff] %v961_v45 }
 0x518   :  { %1389 = shalt.err (!%p1386_p6)
}
 0x519   :  { %s1390_s23 = scalar_lea.hbm %s1680_s7, 256 }
 0x51a   :  { %p1391_p7 = scmp.ne.s32.totalorder %s1680_s7, %s1390_s23  ;;  %p1394_p8 = scmp.lt.u32.totalorder %s1390_s23, %s1680_s7 }
 0x51c   :  { %p1396_p9 = pnand %p1394_p8, %p1391_p7 }
 0x51e   :  { %1399 = shalt.err (!%p1396_p9)
}
 0x51f   :  { %975 = dma.vmem_to_hbm [thread:$0]  %s970_s14, 256, %s1680_s7, [#allocation4], %s1418_s30, %s1418_s30, %s1420_s0  }
 0x520   :  { %1408 = dma.done.wait [#allocation4], 256  }
 0x521   :  { %1409 = vsyncadd [#allocation4], 4294967040 }
 0x522   :  { %979 = vsyncpa [#allocation3], 1 }
 0x523   :  { %980 = vsyncpa [#allocation6], 1 }
 0x524   :  { %981 = vsyncpa [#allocation9], 1 }
 0x525   :  { %982 = vsyncpa [#allocation12], 1 }
 0x526   :  { %983 = vsyncpa [#allocation4], 1 }

</bundles_post_ra>
